<compile_context>
chip_gen: v7x
topology: tpu7x:2x2x1
jax: 0.10.0
libtpu: 0.0.40
codegen_flags: <defaults>
</compile_context>

<pallas_src>
import functools

import jax
import jax.numpy as jnp
from jax.experimental import pallas as pl
from jax.experimental.pallas import tpu as pltpu


MAX_TILE_ELEMS = 512 * 1024          # 2 MiB f32 per tile -> ~8 MiB double-buffered in+out
_LANE_CHOICES = (512, 256, 128)      # lane-dense last dims (multiples of 128)


# --------------------------------------------------------------------------- kernels
def _gamma_decode_kernel(x_ref, o_ref, *, gamma):
    """forward() pre-model step: (x / 255) ** gamma (x assumed >= 0)."""
    u = x_ref[...] * (1.0 / 255.0)
    # x**g written as exp(g*log(x)); log(0) = -inf -> exp(-inf) = 0 == 0**g (g > 0).
    o_ref[...] = jnp.exp(gamma * jnp.log(u)).astype(o_ref.dtype)


def _gamma_encode_kernel(x_ref, o_ref, *, inv_gamma):
    """forward() post step (apply_augmentations=False): inverse gamma + quantize."""
    # relu(x) + 1e-8 then clamp-to-1, fused into a single clip; post-pow clip is then
    # redundant (0 < exp(ig*log(u)) <= 1 for u in [1e-8, 1], ig > 0).
    u = jnp.clip(x_ref[...] + 1e-8, 1e-8, 1.0)
    y = jnp.exp(inv_gamma * jnp.log(u))           # u ** (1/gamma)
    # eval / convert_uint8=True -> floor (kept in output dtype; f32 matches torch.floor)
    o_ref[...] = jnp.floor(y * 255.0).astype(o_ref.dtype)


def _gamma_fused_kernel(x_ref, o_ref, *, gamma, inv_gamma):
    """Fused decode -> encode fast path (no renderer / augmentations in between)."""
    u = x_ref[...] * (1.0 / 255.0)
    d = jnp.exp(gamma * jnp.log(u))               # decoded image in [0, 1]
    v = jnp.clip(d + 1e-8, 1e-8, 1.0)
    y = jnp.exp(inv_gamma * jnp.log(v))
    o_ref[...] = jnp.floor(y * 255.0).astype(o_ref.dtype)


# ------------------------------------------------------------------- slab helpers
def _to_slab(x):
    """Reshape image batch to a lane-dense (rows, lanes) f32 slab without HBM copies
    whenever the element count is a multiple of 128 (reshape is layout-free)."""
    shape = x.shape
    flat = x.reshape(-1).astype(jnp.float32)
    total = flat.shape[0]
    lanes = None
    for cand in _LANE_CHOICES:
        if total % cand == 0:
            lanes = cand
            break
    if lanes is None:
        # TODO(synk): rare unaligned tail (< 128 elems) falls back to one small pad copy.
        lanes = 128
        flat = jnp.pad(flat, (0, (-total) % lanes))
    rows = flat.shape[0] // lanes
    return flat.reshape(rows, lanes), total, shape


def _from_slab(y2d, total, shape):
    if y2d.size == total:
        return y2d.reshape(shape)        # aligned case: free reshape, no copy
    return y2d.reshape(-1)[:total].reshape(shape)


def _pick_tile_rows(rows, lanes):
    """Largest tile <= ~2 MiB; divisor-aware to minimize dead work in the partial block."""
    max_rows = max(8, MAX_TILE_ELEMS // lanes)
    if rows <= max_rows:
        return rows                      # single block == full array dims (always legal)
    best_t, best_w = max_rows, (-rows) % max_rows
    t = max_rows - (max_rows % 8)
    lo = max(8, max_rows // 2)           # stay >= ~1 MiB tiles (near HBM roofline)
    while t >= lo and best_w:
        w = (-rows) % t
        if w < best_w:
            best_t, best_w = t, w
        t -= 8
    return best_t


def _elementwise_call(kernel, x2d, out_dtype=jnp.float32):
    rows, lanes = x2d.shape
    tile_rows = _pick_tile_rows(rows, lanes)
    grid = (pl.cdiv(rows, tile_rows),)   # partial last block: stores are masked by Pallas
    return pl.pallas_call(
        kernel,
        out_shape=jax.ShapeDtypeStruct((rows, lanes), out_dtype),
        grid=grid,
        in_specs=[pl.BlockSpec((tile_rows, lanes), lambda i: (i, 0))],
        out_specs=pl.BlockSpec((tile_rows, lanes), lambda i: (i, 0)),
        compiler_params=pltpu.CompilerParams(
            dimension_semantics=("parallel",),
            # No vmem override: ~8 MiB double-buffered working set fits the default
            # scoped-VMEM budget on v5e (16 MiB), v6e (32 MiB) and v7x (32 MiB).
        ),
    )(x2d)


# ------------------------------------------------------------------- public wrappers
def gamma_decode(images: jnp.ndarray, gamma: float, out_dtype=jnp.float32) -> jnp.ndarray:
    """(image / 255) ** gamma  — the tensor the renderer / augmentations consume."""
    x2d, total, shape = _to_slab(images)
    kernel = functools.partial(_gamma_decode_kernel, gamma=float(gamma))
    y2d = _elementwise_call(kernel, x2d, out_dtype)
    return _from_slab(y2d, total, shape)


def gamma_encode(images: jnp.ndarray, gamma: float, out_dtype=jnp.float32) -> jnp.ndarray:
    """floor(clamp((relu(x)+1e-8)**(1/gamma), 0, 1) * 255)."""
    x2d, total, shape = _to_slab(images)
    kernel = functools.partial(_gamma_encode_kernel, inv_gamma=1.0 / float(gamma))
    y2d = _elementwise_call(kernel, x2d, out_dtype)
    return _from_slab(y2d, total, shape)


def render_model_forward(images: jnp.ndarray, gamma: float = 2.2,
                         fuse: bool = True, out_dtype=jnp.float32) -> jnp.ndarray:
    """images: float NCHW tensor with values in [0, 255].

    fuse=True : eval / no-renderer / no-augmentation fast path, one fused kernel
                (1 HBM read + 1 write instead of 2 + 2).
    fuse=False: split path matching the real data flow, where MarkerRenderer,
                intermediate augmentations and the detection model operate on the
                gamma-decoded image between the two kernels.
    """
    if fuse:
        x2d, total, shape = _to_slab(images)
        kernel = functools.partial(
            _gamma_fused_kernel, gamma=float(gamma), inv_gamma=1.0 / float(gamma))
        y2d = _elementwise_call(kernel, x2d, out_dtype)
        return _from_slab(y2d, total, shape)
    x = gamma_decode(images, gamma)
    # TODO(synk): self.renderer (MarkerRenderer), self.intermediate_augmentations and
    # self.model (detection model) run here on the decoded image; they depend on external
    # sub-models / per-sample RNG and have no standalone Pallas equivalent.
    return gamma_encode(x, gamma, out_dtype)


# ------------------------------------------------------------------------- reference
def _reference_decode(images, gamma):
    return (images / 255.0) ** gamma


def _reference(images, gamma):
    x = _reference_decode(images, gamma)
    y = (jnp.maximum(x, 0.0) + 1e-8) ** (1.0 / gamma)
    y = jnp.clip(y, 0.0, 1.0) * 255.0
    return jnp.floor(y)


if __name__ == "__main__":
    key = jax.random.PRNGKey(0)
    B, C, H, W = 2, 3, 16, 16
    # deterministic "images" with pixel values in [0, 255]
    images = jax.random.uniform(key, (B, C, H, W), dtype=jnp.float32) * 255.0
    gamma = 2.2  # cfg.RENDERER.GAMMA

    # decode-only check (tensor the renderer / augmentations would consume)
    dec = jax.block_until_ready(gamma_decode(images, gamma))
    dec_ref = _reference_decode(images, gamma)
    assert dec.shape == (B, C, H, W)
    assert jnp.max(jnp.abs(dec - dec_ref)) <= 1e-5

    ref = _reference(images, gamma)

    # fused eval fast path
    out_fused = jax.block_until_ready(render_model_forward(images, gamma, fuse=True))
    assert out_fused.shape == (B, C, H, W) and out_fused.dtype == jnp.float32
    # floor() can flip by 1 ULP near integer boundaries; allow tolerance of 1.
    assert jnp.max(jnp.abs(out_fused - ref)) <= 1.0

    # split pre -> (external modules) -> post path
    out_split = jax.block_until_ready(render_model_forward(images, gamma, fuse=False))
    assert out_split.shape == (B, C, H, W) and out_split.dtype == jnp.float32
    assert jnp.max(jnp.abs(out_split - ref)) <= 1.0

    print("KERNEL_OK")
</pallas_src>

<mosaic_0001>
module attributes {stable_mosaic.version = 11 : i64} {
  func.func @_gamma_decode_kernel(%arg0: i32, %arg1: memref<3x512xf32, #tpu.memory_space<vmem>>, %arg2: memref<3x512xf32, #tpu.memory_space<vmem>>) attributes {dimension_semantics = [#tpu.dimension_semantics<parallel>], iteration_bounds = array<i64: 1>, scalar_prefetch = 0 : i64, scratch_operands = 0 : i64, tpu.core_type = #tpu.core_type<tc>, window_params = [{transform_indices = @transform_0, window_bounds = array<i64: 3, 512>}, {transform_indices = @transform_1, window_bounds = array<i64: 3, 512>}]} {
    %c0 = arith.constant 0 : index
    %c0_0 = arith.constant 0 : index
    %0 = vector.load %arg1[%c0, %c0_0] : memref<3x512xf32, #tpu.memory_space<vmem>>, vector<3x512xf32>
    %cst = arith.constant 0.00392156886 : f32
    %1 = vector.broadcast %cst : f32 to vector<3x512xf32>
    %2 = arith.mulf %0, %1 : vector<3x512xf32>
    %3 = math.log %2 : vector<3x512xf32>
    %cst_1 = arith.constant 2.200000e+00 : f32
    %4 = vector.broadcast %cst_1 : f32 to vector<3x512xf32>
    %5 = arith.mulf %4, %3 : vector<3x512xf32>
    %6 = math.exp %5 : vector<3x512xf32>
    %c0_2 = arith.constant 0 : index
    %c0_3 = arith.constant 0 : index
    %7 = vector.load %arg2[%c0_2, %c0_3] : memref<3x512xf32, #tpu.memory_space<vmem>>, vector<3x512xf32>
    tpu.vector_store %arg2[%c0_2, %c0_3], %6 {strides = array<i32>} : memref<3x512xf32, #tpu.memory_space<vmem>>, vector<3x512xf32>,
    return
  }
  func.func @transform_0(%arg0: i32) -> (i32, i32) {
    %c0_i32 = arith.constant 0 : i32
    %c0_i32_0 = arith.constant 0 : i32
    return %arg0, %c0_i32 : i32, i32
  }
  func.func @transform_1(%arg0: i32) -> (i32, i32) {
    %c0_i32 = arith.constant 0 : i32
    %c0_i32_0 = arith.constant 0 : i32
    return %arg0, %c0_i32 : i32, i32
  }
}

</mosaic_0001>

<bundles_post_ra>
// kernel: tpu_custom_call.1
= control target key start
LH: loop header
LB: loop body
LE: loop exit
PB: predicated region body
PF: predicated region fallthrough
CT: control target
= control target key end

     0   :  { %6 = vsyncpa [#allocation3], 0  ;;  %s146_s0 = inlined_call_operand.hbm [shape: f32[3,512], index: 0, kind: input, shape index: {}]   ;;  %s147_s1 = inlined_call_operand.hbm [shape: f32[3,512], index: 1, kind: output, shape index: {}]  }
   0x1   :  { %7 = vsyncpa [#allocation4], 0  ;;  %s110_s6 = smov [#allocation2]   ;;  %s62_s10 = scalar_lea.hbm %s146_s0, 256 }
   0x2   :  { %s14_s7 = sshll.u32 %s110_s6, 4  ;;  %p63_p0 = scmp.ne.s32.totalorder %s146_s0, %s62_s10  ;;  %s15_s7 = int_to_ptr.vmem [resolvable:$true] %s14_s7 }
   0x3   :  { %p66_p1 = scmp.lt.u32.totalorder %s62_s10, %s146_s0 }
   0x5   :  { %p68_p2 = pnand %p66_p1, %p63_p0 }
   0x7   :  { %71 = shalt.err (!%p68_p2)
}
   0x8   :  { %s72_s15 = scalar_lea.vmem %s15_s7, 256  ;;  %p77_p4 = scmp.lt.s32.totalorder %s15_s7, %s15_s7 }
   0x9   :  { %p73_p3 = scmp.ne.s32.totalorder %s15_s7, %s72_s15  ;;  %p78_p5 = scmp.lt.s32.totalorder %s72_s15, %s72_s15 }
   0xb   :  { %p79_p6 = por %p78_p5, %p77_p4 }
   0xd   :  { %p80_p7 = pnand %p79_p6, %p73_p3 }
   0xf   :  { %83 = shalt.err (!%p80_p7)
}
  0x10   :  { %17 = dma.hbm_to_vmem [thread:$0]  %s146_s0, 256, %s15_s7, [#allocation3]  }
  0x11   :  { %106 = dma.done.wait [#allocation3], 256  }
  0x12   :  { %107 = vsyncadd [#allocation3], 4294967040  ;;  %v21_v0 = vld [vmem:[#allocation2] sm:$0x77]  ;;  %v22_v1 = vld [vmem:[#allocation2 + $0x8] sm:$0x77] }
  0x13   :  { %v23_v2 = vmul.f32 0.003921569, %v21_v0  ;;  %v24_v3 = vmul.f32 0.003921569, %v22_v1  ;;  %s111_s18 = smov [#allocation5]  }
  0x14   :  { %s43_s0 = sshll.u32 %s111_s18, 4  ;;  %s44_s0 = int_to_ptr.vmem [resolvable:$true] %s43_s0 }
  0x15   :  { %54 = vlog2.f32 %v23_v2  ;;  %s84_s19 = scalar_lea.vmem %s44_s0, 256  ;;  %p89_p9 = scmp.lt.s32.totalorder %s44_s0, %s44_s0 }
  0x16   :  { %56 = vlog2.f32 %v24_v3  ;;  %p85_p8 = scmp.ne.s32.totalorder %s44_s0, %s84_s19  ;;  %p90_p10 = scmp.lt.s32.totalorder %s84_s19, %s84_s19 }
  0x18   :  { %p91_p11 = por %p90_p10, %p89_p9 }
  0x1a   :  { %p92_p12 = pnand %p91_p11, %p85_p8 }
  0x1f   :  { %v55_v4 = vpop.eup %54 }
  0x20   :  { %v57_v5 = vpop.eup %56  ;;  %v26_v6 = vmul.f32 0.6931472, %v55_v4 }
  0x21   :  { %v28_v7 = vmul.f32 0.6931472, %v57_v5 }
  0x22   :  { %v29_v8 = vmul.f32 2.2, %v26_v6 }
  0x23   :  { %v30_v9 = vmul.f32 2.2, %v28_v7 }
  0x24   :  { %v31_v10 = vmul.f32 1.442695, %v29_v8 }
  0x25   :  { %v33_v11 = vmul.f32 1.442695, %v30_v9 }
  0x26   :  { %58 = vpow2.f32 %v31_v10 }
  0x27   :  { %60 = vpow2.f32 %v33_v11 }
  0x30   :  { %v59_v12 = vpop.eup %58 }
  0x31   :  { %v61_v13 = vpop.eup %60  ;;  %35 = vst [vmem:[#allocation5] sm:$0x77] %v59_v12 }
  0x32   :  { %36 = vst [vmem:[#allocation5 + $0x8] sm:$0x77] %v61_v13 }
  0x33   :  { %95 = shalt.err (!%p92_p12)
}
  0x34   :  { %s96_s22 = scalar_lea.hbm %s147_s1, 256 }
  0x35   :  { %p97_p13 = scmp.ne.s32.totalorder %s147_s1, %s96_s22  ;;  %p100_p0 = scmp.lt.u32.totalorder %s96_s22, %s147_s1 }
  0x37   :  { %p102_p1 = pnand %p100_p0, %p97_p13 }
  0x39   :  { %105 = shalt.err (!%p102_p1)
}
  0x3a   :  { %46 = dma.vmem_to_hbm [thread:$0]  %s44_s0, 256, %s147_s1, [#allocation4]  }
  0x3b   :  { %108 = dma.done.wait [#allocation4], 256  }
  0x3c   :  { %109 = vsyncadd [#allocation4], 4294967040 }
  0x3d   :  { %50 = vsyncpa [#allocation3], 1 }
  0x3e   :  { %51 = vsyncpa [#allocation4], 1 }

</bundles_post_ra>
